<compile_context>
chip_gen: v7x
topology: tpu7x:2x2x1
jax: 0.10.0
libtpu: 0.0.40
codegen_flags: <defaults>
</compile_context>

<pallas_src>
import functools

import jax
import jax.numpy as jnp
from jax.experimental import pallas as pl
from jax.experimental.pallas import tpu as pltpu


def _round_up(x, m):
    return ((x + m - 1) // m) * m


def _proj_kernel(x_ref, w_ref, b_ref, o_ref):
    # One (tm, tn) output tile: x (tm, D) @ w (D, tn) + b (1, tn).
    acc = jnp.dot(x_ref[...], w_ref[...], preferred_element_type=jnp.float32)
    o_ref[...] = (acc + b_ref[...]).astype(o_ref.dtype)


def _logsoftmax_kernel(x_ref, w_ref, b_ref, o_ref, m_ref, l_ref, *, tn, n_vtiles):
    # Grid: (row_tiles, vocab_tiles); vocab axis is last and "arbitrary".
    # o_ref is the full (tm, V_pad) row slab, resident in VMEM across the
    # vocab sweep (its block index is constant over j).
    j = pl.program_id(1)

    @pl.when(j == 0)
    def _init():
        m_ref[...] = jnp.full(m_ref.shape, -jnp.inf, dtype=m_ref.dtype)
        l_ref[...] = jnp.zeros(l_ref.shape, dtype=l_ref.dtype)

    logits = jnp.dot(x_ref[...], w_ref[...], preferred_element_type=jnp.float32)
    logits = logits + b_ref[...]                       # (tm, tn) f32

    # Online logsumexp over vocab tiles.
    m_prev = m_ref[...]
    m_new = jnp.maximum(m_prev, jnp.max(logits, axis=-1, keepdims=True))
    l_ref[...] = (l_ref[...] * jnp.exp(m_prev - m_new)
                  + jnp.sum(jnp.exp(logits - m_new), axis=-1, keepdims=True))
    m_ref[...] = m_new

    # Stash raw logits for this vocab tile into the resident output slab.
    col = pl.multiple_of(j * tn, tn)
    o_ref[:, pl.ds(col, tn)] = logits.astype(o_ref.dtype)

    @pl.when(j == n_vtiles - 1)
    def _finalize():
        lse = m_ref[...] + jnp.log(l_ref[...])         # (tm, 1) f32
        # Chunked in-place correction (static slices) to bound vreg pressure.
        for t in range(n_vtiles):
            sl = slice(t * tn, (t + 1) * tn)
            o_ref[:, sl] = (o_ref[:, sl].astype(jnp.float32) - lse).astype(o_ref.dtype)


def generator(x, w, b, *, log_softmax=False, block_rows=256, block_cols=2048,
              mxu_dtype=None, out_dtype=None):
    """x: (..., D). w: (D, V). b: (V,). Returns (..., V).

    log_softmax=False -> proj(x); log_softmax=True -> log_softmax(proj(x), -1).
    mxu_dtype: optional MXU operand dtype (e.g. jnp.bfloat16); cast happens
    once in the wrapper, accumulation stays f32.
    """
    batch_dims = x.shape[:-1]
    D = x.shape[-1]
    Dw, V = w.shape
    assert D == Dw, (D, Dw)

    R = 1
    for d in batch_dims:
        R *= int(d)
    x2 = x.reshape(R, D)

    # Pre-cast operands once (outside the kernel -> no per-step VALU cast of W).
    if mxu_dtype is not None:
        x2 = x2.astype(mxu_dtype)
        w = w.astype(mxu_dtype)
    elif w.dtype != x2.dtype:
        w = w.astype(x2.dtype)
    b2 = b.astype(jnp.float32).reshape(1, V)

    if out_dtype is None:
        out_dtype = jnp.float32 if log_softmax else x.dtype

    # Row tile: multiple of 8 sublanes (bf16 packing is also happy with >=16);
    # ragged last tile is masked by Pallas -- no jnp.pad copy of x.
    tm = min(int(block_rows), _round_up(R, 8))
    tm = max(8, (tm // 8) * 8)
    n_rtiles = pl.cdiv(R, tm)

    # Vocab tile: multiple of 128 lanes. Prefer a divisor of V (no padding);
    # otherwise pad W/bias (one-time, weights-side) up to a multiple of tn.
    tn_cap = max(128, (min(int(block_cols), _round_up(V, 128)) // 128) * 128)
    tn = tn_cap
    for cand in range(tn_cap, 511, -128):
        if V % cand == 0:
            tn = cand
            break
    v_pad = _round_up(V, tn)
    n_vtiles = v_pad // tn

    if v_pad != V:
        w = jnp.pad(w, ((0, 0), (0, v_pad - V)))
        # Large negative bias on padded columns: exp() underflows to 0, so the
        # logsumexp is unaffected; padded outputs are sliced off below.
        b2 = jnp.pad(b2, ((0, 0), (0, v_pad - V)), constant_values=-1e30)

    # VMEM budget from the actual tile footprint (+ headroom), not the scoped
    # default (16/32 MiB), so large tiles actually compile.
    isz = lambda dt: jnp.dtype(dt).itemsize
    vmem = 0
    vmem += 2 * tm * D * isz(x2.dtype)            # x tile (double-buffered)
    vmem += 2 * D * tn * isz(w.dtype)             # w tile
    vmem += 2 * 8 * tn * 4                        # bias tile (sublane-padded)
    if log_softmax:
        vmem += 2 * tm * v_pad * isz(out_dtype)   # resident output row slab
        vmem += 2 * tm * 128 * 4                  # m / l scratch (lane-padded)
    else:
        vmem += 2 * tm * tn * isz(out_dtype)
    vmem_limit = min(max(int(vmem * 3 // 2) + (4 << 20), 32 << 20), 128 << 20)

    cost = pl.CostEstimate(
        flops=2 * R * D * v_pad,
        transcendentals=(R * v_pad if log_softmax else 0),
        bytes_accessed=(x2.size * isz(x2.dtype) + w.size * isz(w.dtype)
                        + b2.size * 4 + R * v_pad * isz(out_dtype)),
    )

    in_specs = [
        pl.BlockSpec((tm, D), lambda i, j: (i, 0)),   # x row tile (resident over j)
        pl.BlockSpec((D, tn), lambda i, j: (0, j)),   # streamed weight tile
        pl.BlockSpec((1, tn), lambda i, j: (0, j)),   # streamed bias tile
    ]

    if log_softmax:
        kernel = functools.partial(_logsoftmax_kernel, tn=tn, n_vtiles=n_vtiles)
        out = pl.pallas_call(
            kernel,
            out_shape=jax.ShapeDtypeStruct((R, v_pad), out_dtype),
            grid=(n_rtiles, n_vtiles),
            in_specs=in_specs,
            # Whole padded-vocab row slab, resident across the vocab sweep.
            out_specs=pl.BlockSpec((tm, v_pad), lambda i, j: (i, 0)),
            scratch_shapes=[pltpu.VMEM((tm, 1), jnp.float32),   # running max
                            pltpu.VMEM((tm, 1), jnp.float32)],  # running sum-exp
            compiler_params=pltpu.CompilerParams(
                dimension_semantics=("parallel", "arbitrary"),
                vmem_limit_bytes=vmem_limit),
            cost_estimate=cost,
        )(x2, w, b2)
    else:
        out = pl.pallas_call(
            _proj_kernel,
            out_shape=jax.ShapeDtypeStruct((R, v_pad), out_dtype),
            grid=(n_rtiles, n_vtiles),
            in_specs=in_specs,
            out_specs=pl.BlockSpec((tm, tn), lambda i, j: (i, j)),
            compiler_params=pltpu.CompilerParams(
                dimension_semantics=("parallel", "parallel"),
                vmem_limit_bytes=vmem_limit),
            cost_estimate=cost,
        )(x2, w, b2)

    if v_pad != V:
        out = out[:, :V]
    return out.reshape(*batch_dims, V)


if __name__ == "__main__":
    # Small shapes implied by the transformer Generator: (batch, seq, d_model)
    # projected to a (lane-dense) vocab.
    B, S, D, V = 2, 8, 32, 128

    key = jax.random.PRNGKey(0)
    kx, kw, kb = jax.random.split(key, 3)

    x = jax.random.normal(kx, (B, S, D), dtype=jnp.float32)
    w = jax.random.normal(kw, (D, V), dtype=jnp.float32) * (1.0 / jnp.sqrt(D))
    b = jax.random.normal(kb, (V,), dtype=jnp.float32) * 0.01

    # forward(x)              -> plain projection.
    logits = generator(x, w, b, log_softmax=False)
    # forward(x, softmax=...) -> log_softmax(proj(x)); f32 MXU and bf16 MXU.
    logp_f32 = generator(x, w, b, log_softmax=True)
    logp_bf16 = generator(x, w, b, log_softmax=True, mxu_dtype=jnp.bfloat16)
    jax.block_until_ready((logits, logp_f32, logp_bf16))

    # Pure-JAX reference.
    ref_logits = x @ w + b
    ref_logp = jax.nn.log_softmax(ref_logits, axis=-1)

    assert logits.shape == (B, S, V) and logits.dtype == x.dtype
    assert logp_f32.shape == (B, S, V) and logp_f32.dtype == jnp.float32
    assert bool(jnp.isfinite(logits).all())
    assert bool(jnp.allclose(logits, ref_logits, atol=5e-3, rtol=5e-3))
    assert bool(jnp.allclose(logp_f32, ref_logp, atol=5e-3, rtol=5e-3))
    # bf16-MXU path: quantized operands (expected precision loss) -- rows must
    # still exponentiate-sum to 1.
    probs_sum = jnp.exp(logp_bf16.astype(jnp.float32)).sum(axis=-1)
    assert bool(jnp.allclose(probs_sum, 1.0, atol=1e-2)), probs_sum

    print("KERNEL_OK")
</pallas_src>

<mosaic_0001>
module attributes {stable_mosaic.version = 11 : i64} {
  func.func @_proj_kernel(%arg0: i32, %arg1: i32, %arg2: memref<16x32xf32, #tpu.memory_space<vmem>>, %arg3: memref<32x128xf32, #tpu.memory_space<vmem>>, %arg4: memref<1x128xf32, #tpu.memory_space<vmem>>, %arg5: memref<16x128xf32, #tpu.memory_space<vmem>>) attributes {dimension_semantics = [#tpu.dimension_semantics<parallel>, #tpu.dimension_semantics<parallel>], iteration_bounds = array<i64: 1, 1>, scalar_prefetch = 0 : i64, scratch_operands = 0 : i64, tpu.core_type = #tpu.core_type<tc>, window_params = [{transform_indices = @transform_0, window_bounds = array<i64: 16, 32>}, {transform_indices = @transform_1, window_bounds = array<i64: 32, 128>}, {transform_indices = @transform_2, window_bounds = array<i64: 1, 128>}, {transform_indices = @transform_3, window_bounds = array<i64: 16, 128>}]} {
    %c0 = arith.constant 0 : index
    %c0_0 = arith.constant 0 : index
    %0 = vector.load %arg2[%c0, %c0_0] : memref<16x32xf32, #tpu.memory_space<vmem>>, vector<16x32xf32>
    %c0_1 = arith.constant 0 : index
    %c0_2 = arith.constant 0 : index
    %1 = vector.load %arg3[%c0_1, %c0_2] : memref<32x128xf32, #tpu.memory_space<vmem>>, vector<32x128xf32>
    %cst = arith.constant dense<0.000000e+00> : vector<16x128xf32>
    %2 = tpu.matmul %0, %1, %cst {dimension_numbers = #tpu.dot_dimension_numbers<[1], [0], [0], [1], [0, 0, 1, 1], [], []>} : vector<16x32xf32>, vector<32x128xf32>, vector<16x128xf32> -> vector<16x128xf32>
    %c0_3 = arith.constant 0 : index
    %c0_4 = arith.constant 0 : index
    %3 = vector.load %arg4[%c0_3, %c0_4] : memref<1x128xf32, #tpu.memory_space<vmem>>, vector<1x128xf32>
    %4 = vector.broadcast %3 : vector<1x128xf32> to vector<16x128xf32>
    %5 = arith.addf %2, %4 : vector<16x128xf32>
    %c0_5 = arith.constant 0 : index
    %c0_6 = arith.constant 0 : index
    %6 = vector.load %arg5[%c0_5, %c0_6] : memref<16x128xf32, #tpu.memory_space<vmem>>, vector<16x128xf32>
    tpu.vector_store %arg5[%c0_5, %c0_6], %5 {strides = array<i32>} : memref<16x128xf32, #tpu.memory_space<vmem>>, vector<16x128xf32>,
    return
  }
  func.func @transform_0(%arg0: i32, %arg1: i32) -> (i32, i32) {
    %c0_i32 = arith.constant 0 : i32
    %c0_i32_0 = arith.constant 0 : i32
    return %arg0, %c0_i32 : i32, i32
  }
  func.func @transform_1(%arg0: i32, %arg1: i32) -> (i32, i32) {
    %c0_i32 = arith.constant 0 : i32
    %c0_i32_0 = arith.constant 0 : i32
    return %c0_i32, %arg1 : i32, i32
  }
  func.func @transform_2(%arg0: i32, %arg1: i32) -> (i32, i32) {
    %c0_i32 = arith.constant 0 : i32
    %c0_i32_0 = arith.constant 0 : i32
    return %c0_i32, %arg1 : i32, i32
  }
  func.func @transform_3(%arg0: i32, %arg1: i32) -> (i32, i32) {
    %c0_i32 = arith.constant 0 : i32
    return %arg0, %arg1 : i32, i32
  }
}

</mosaic_0001>

<bundles_post_ra>
// kernel: tpu_custom_call.1
= control target key start
LH: loop header
LB: loop body
LE: loop exit
PB: predicated region body
PF: predicated region fallthrough
CT: control target
= control target key end

     0   :  { %8 = vsyncpa [#allocation3], 0  ;;  %s336_s0 = inlined_call_operand.hbm [shape: f32[16,32], index: 0, kind: input, shape index: {}]   ;;  %s337_s1 = inlined_call_operand.hbm [shape: f32[32,128], index: 1, kind: input, shape index: {}]   ;;  %s338_s2 = inlined_call_operand.vmem [shape: f32[1,128], index: 2, kind: input, shape index: {}]   ;;  %s339_s3 = inlined_call_operand.hbm [shape: f32[16,128], index: 3, kind: output, shape index: {}]  }
   0x1   :  { %9 = vsyncpa [#allocation6], 0 }
   0x2   :  { %10 = vsyncpa [#allocation4], 0  ;;  %s263_s12 = smov [#allocation2]   ;;  %s191_s16 = scalar_lea.hbm %s336_s0, 256 }
   0x3   :  { %s16_s13 = sshll.u32 %s263_s12, 4  ;;  %p192_p0 = scmp.ne.s32.totalorder %s336_s0, %s191_s16  ;;  %s17_s13 = int_to_ptr.vmem [resolvable:$true] %s16_s13 }
   0x4   :  { %p195_p1 = scmp.lt.u32.totalorder %s191_s16, %s336_s0 }
   0x6   :  { %p197_p2 = pnand %p195_p1, %p192_p0 }
   0x8   :  { %200 = shalt.err (!%p197_p2)
}
   0x9   :  { %s201_s21 = scalar_lea.vmem %s17_s13, 256  ;;  %p206_p4 = scmp.lt.s32.totalorder %s17_s13, %s17_s13 }
   0xa   :  { %p202_p3 = scmp.ne.s32.totalorder %s17_s13, %s201_s21  ;;  %p207_p5 = scmp.lt.s32.totalorder %s201_s21, %s201_s21 }
   0xc   :  { %p208_p6 = por %p207_p5, %p206_p4 }
   0xe   :  { %p209_p7 = pnand %p208_p6, %p202_p3 }
  0x10   :  { %212 = shalt.err (!%p209_p7)
}
  0x11   :  { %s264_s22 = smov 128   ;;  %s265_s23 = smov 8  }
  0x12   :  { %22 = dma.hbm_to_vmem [thread:$0]  %s336_s0, 256, %s17_s13, [#allocation3], %s264_s22, %s264_s22, %s265_s23  }
  0x13   :  { %s266_s26 = smov [#allocation5]   ;;  %s213_s30 = scalar_lea.hbm %s337_s1, 512 }
  0x14   :  { %s28_s27 = sshll.u32 %s266_s26, 4  ;;  %p214_p8 = scmp.ne.s32.totalorder %s337_s1, %s213_s30  ;;  %s29_s27 = int_to_ptr.vmem [resolvable:$true] %s28_s27 }
  0x15   :  { %p217_p9 = scmp.lt.u32.totalorder %s213_s30, %s337_s1 }
  0x17   :  { %p219_p10 = pnand %p217_p9, %p214_p8 }
  0x19   :  { %222 = shalt.err (!%p219_p10)
}
  0x1a   :  { %s223_s8 = scalar_lea.vmem %s29_s27, 512  ;;  %p228_p12 = scmp.lt.s32.totalorder %s29_s27, %s29_s27 }
  0x1b   :  { %p224_p11 = scmp.ne.s32.totalorder %s29_s27, %s223_s8  ;;  %p229_p13 = scmp.lt.s32.totalorder %s223_s8, %s223_s8 }
  0x1d   :  { %p230_p0 = por %p229_p13, %p228_p12 }
  0x1f   :  { %p231_p1 = pnand %p230_p0, %p224_p11 }
  0x21   :  { %234 = shalt.err (!%p231_p1)
}
  0x22   :  { %34 = dma.hbm_to_vmem [thread:$0]  %s337_s1, 512, %s29_s27, [#allocation6], %s264_s22, %s264_s22, %s265_s23  }
  0x23   :  { %257 = dma.done.wait [#allocation3], 256  }
  0x24   :  { %258 = vsyncadd [#allocation3], 4294967040 }
  0x25   :  { %259 = dma.done.wait [#allocation6], 512  }
  0x26   :  { %260 = vsyncadd [#allocation6], 4294966784  ;;  %vm56_vm0 = vcmask 261120   ;;  %v45_v0 = vld [vmem:[#allocation5] sm:$0xff]  ;;  %v46_v1 = vld [vmem:[#allocation5 + $0x8] sm:$0xff]  ;;  %s267_s11 = smov [#allocation7]  }
  0x27   :  { %v47_v2 = vld [vmem:[#allocation5 + $0x10] sm:$0xff]  ;;  %v178_v3 = vpack.c.bf16 %v46_v1, %v45_v0  ;;  %v48_v4 = vld [vmem:[#allocation5 + $0x18] sm:$0xff]  ;;  %s145_s12 = sshll.u32 %s267_s11, 4  ;;  %s146_s12 = int_to_ptr.vmem [resolvable:$true] %s145_s12 }
  0x28   :  { %v43_v5 = vld [vmem:[#allocation2] sm:$0xff]  ;;  %v182_v6 = vpack.c.bf16 %v48_v4, %v47_v2  ;;  %v44_v7 = vld [vmem:[#allocation2 + $0x8] sm:$0xff]  ;;  %s235_s13 = scalar_lea.vmem %s146_s12, 256  ;;  %p240_p3 = scmp.lt.s32.totalorder %s146_s12, %s146_s12 }
  0x29   :  { %175 = vmatprep.mubr.msk.f32.mxu0 %vm56_vm0, %v43_v5  ;;  %179 = vmatprep.subr.bf16.mxu0 %v178_v3  ;;  %v158_v8 = vld [vmem:[%s338_s2] ss:$0 sm:$0xff]  ;;  %p236_p2 = scmp.ne.s32.totalorder %s146_s12, %s235_s13  ;;  %p241_p4 = scmp.lt.s32.totalorder %s235_s13, %s235_s13 }
  0x2a   :  { %181 = vmatpush3.bf16.msra.mxu0 %v178_v3 }
  0x2b   :  { %183 = vmatprep.subr.bf16.mxu0 %v182_v6  ;;  %p242_p5 = por %p241_p4, %p240_p3 }
  0x2d   :  { %p243_p6 = pnand %p242_p5, %p236_p2 }
  0x2e   :  { %185 = vmatpush3.bf16.msra.mxu0 %v182_v6 }
  0x31   :  { %176 = vmatmul.mubr.msk.f32.vlgmr.msra.gmra.mrb[0].mxu0 %vm56_vm0, %v44_v7 }
 0x104   :  { %v177_v9 = vpop.f32.mrb[0].mxu0 }
 0x105   :  { %v135_v10 = vadd.f32 %v177_v9, %v158_v8  ;;  %v129_v11 = vpop.f32.mrb[1].mxu0 }
 0x106   :  { %v130_v12 = vadd.f32 %v158_v8, %v129_v11 }
 0x107   :  { %139 = vst [vmem:[#allocation7 + $0x8] sm:$0xff] %v135_v10 }
 0x108   :  { %138 = vst [vmem:[#allocation7] sm:$0xff] %v130_v12 }
 0x109   :  { %246 = shalt.err (!%p243_p6)
}
 0x10a   :  { %s247_s2 = scalar_lea.hbm %s339_s3, 256 }
 0x10b   :  { %p248_p7 = scmp.ne.s32.totalorder %s339_s3, %s247_s2  ;;  %p251_p8 = scmp.lt.u32.totalorder %s247_s2, %s339_s3 }
 0x10d   :  { %p253_p9 = pnand %p251_p8, %p248_p7 }
 0x10f   :  { %256 = shalt.err (!%p253_p9)
}
 0x110   :  { %151 = dma.vmem_to_hbm [thread:$0]  %s146_s12, 256, %s339_s3, [#allocation4], %s264_s22, %s264_s22, %s265_s23  }
 0x111   :  { %261 = dma.done.wait [#allocation4], 256  }
 0x112   :  { %262 = vsyncadd [#allocation4], 4294967040 }
 0x113   :  { %155 = vsyncpa [#allocation3], 1 }
 0x114   :  { %156 = vsyncpa [#allocation6], 1 }
 0x115   :  { %157 = vsyncpa [#allocation4], 1 }

</bundles_post_ra>
